<compile_context>
chip_gen: v7x
topology: tpu7x:2x2x1
jax: 0.10.0
libtpu: 0.0.40
codegen_flags: <defaults>
</compile_context>

<pallas_src>
import functools

import jax
import jax.numpy as jnp
from jax.experimental import pallas as pl
from jax.experimental.pallas import tpu as pltpu

EPS = 1e-5           # nn.BatchNorm1d default eps
_BIAS_STRIDE = 128   # each packed bias starts at a 128-lane boundary
_HIDDEN = (32, 32, 64, 32)


def _mlp_kernel(x_ref, w1, w2, w3, w4, w5t, b_ref, out_ref):
    """Fused 5-layer MLP (ReLU; eval-mode BN pre-folded into the weights).

    x_ref : (TILE_B, in_dim)
    w1..w4: (Cin, Cout) folded weights; w5t: (1, 32) final-layer weight row
    b_ref : (1, 5*128) packed biases, layer k occupying lanes [k*128, k*128+Ck)
    """

    def layer(h, w_ref, k, cout):
        b = b_ref[:, k * _BIAS_STRIDE:k * _BIAS_STRIDE + cout]          # static slice
        return jnp.maximum(
            jnp.dot(h, w_ref[...], preferred_element_type=jnp.float32) + b, 0.0)

    h = x_ref[...]
    h = layer(h, w1, 0, 32)
    h = layer(h, w2, 1, 32)
    h = layer(h, w3, 2, 64)
    h = layer(h, w4, 3, 32)

    # Regression head (Cout = 1): VPU multiply + lane reduction, no 1-column MXU call.
    b5 = b_ref[:, 4 * _BIAS_STRIDE:4 * _BIAS_STRIDE + 1]
    out_ref[...] = jnp.sum(h * w5t[...], axis=-1, keepdims=True) + b5


def _fold_params(p):
    """Fold eval-mode BN_k into Linear_{k+1}; pack all biases into one (1, 640) array."""

    def fold(w, b, g, be, m, v):
        s = g * jax.lax.rsqrt(v + EPS)      # (Cin,)
        t = be - m * s                      # (Cin,)
        return w * s[:, None], b + t @ w    # (Cin, Cout), (Cout,)

    w1, b1 = p["w1"], p["b1"]
    w2, b2 = fold(p["w2"], p["b2"], p["g1"], p["be1"], p["m1"], p["v1"])
    w3, b3 = fold(p["w3"], p["b3"], p["g2"], p["be2"], p["m2"], p["v2"])
    w4, b4 = fold(p["w4"], p["b4"], p["g3"], p["be3"], p["m3"], p["v3"])
    w5, b5 = fold(p["w5"], p["b5"], p["g4"], p["be4"], p["m4"], p["v4"])

    biases = jnp.zeros((1, 5 * _BIAS_STRIDE), jnp.float32)
    for k, b in enumerate((b1, b2, b3, b4, b5)):
        biases = biases.at[0, k * _BIAS_STRIDE:k * _BIAS_STRIDE + b.shape[0]].set(b)

    return w1, w2, w3, w4, w5.T, biases     # w5.T -> (1, 32)


def _round_up(x, m):
    return (x + m - 1) // m * m


@functools.partial(jax.jit, static_argnames=("tile_b",))
def swish_regressor_forward(x, params, *, tile_b=1024):
    """x: (B, in_dim) f32; params: dict of Linear (in,out)/(out,) and BN (C,) arrays."""
    B, in_dim = x.shape
    w1, w2, w3, w4, w5t, biases = _fold_params(params)

    # Batch-tiled grid: x/out are streamed in TILE_B-row tiles, weights/biases keep a
    # constant block index (VMEM-resident across iterations, DMA'd once).
    tile = min(tile_b, _round_up(B, 8))
    bp = _round_up(B, tile)
    if bp != B:
        x = jnp.pad(x, ((0, bp - B), (0, 0)))
    grid = (bp // tile,)

    flops = 2 * bp * (in_dim * 32 + 32 * 32 + 32 * 64 + 64 * 32 + 32 * 1)
    bytes_accessed = 4 * (x.size + w1.size + w2.size + w3.size + w4.size
                          + w5t.size + biases.size + bp * 1)

    def const_map(i):
        return (0, 0)

    out = pl.pallas_call(
        _mlp_kernel,
        out_shape=jax.ShapeDtypeStruct((bp, 1), jnp.float32),
        grid=grid,
        in_specs=[
            pl.BlockSpec((tile, in_dim), lambda i: (i, 0)),
            pl.BlockSpec(w1.shape, const_map),
            pl.BlockSpec(w2.shape, const_map),
            pl.BlockSpec(w3.shape, const_map),
            pl.BlockSpec(w4.shape, const_map),
            pl.BlockSpec(w5t.shape, const_map),
            pl.BlockSpec(biases.shape, const_map),
        ],
        out_specs=pl.BlockSpec((tile, 1), lambda i: (i, 0)),
        compiler_params=pltpu.CompilerParams(
            dimension_semantics=("parallel",)),
        cost_estimate=pl.CostEstimate(
            flops=flops, transcendentals=0, bytes_accessed=bytes_accessed),
    )(x, w1, w2, w3, w4, w5t, biases)
    return out[:B]


def _init_params(key, in_dim):
    """Deterministic params mirroring the module's layer shapes.

    Linear: PyTorch default U(-1/sqrt(fan_in), 1/sqrt(fan_in)).
    BatchNorm: gamma/beta/running stats get small random values so the eval-mode
    BN math (and its folding) is actually exercised.
    """
    dims = [(in_dim, 32), (32, 32), (32, 64), (64, 32), (32, 1)]
    params = {}
    keys = jax.random.split(key, 32)
    ki = 0
    for i, (fin, fout) in enumerate(dims, start=1):
        bound = 1.0 / jnp.sqrt(jnp.float32(fin))
        params[f"w{i}"] = jax.random.uniform(keys[ki], (fin, fout), jnp.float32, -bound, bound); ki += 1
        params[f"b{i}"] = jax.random.uniform(keys[ki], (fout,), jnp.float32, -bound, bound); ki += 1
    for i, c in enumerate(_HIDDEN, start=1):
        params[f"g{i}"] = 1.0 + 0.1 * jax.random.normal(keys[ki], (c,), jnp.float32); ki += 1
        params[f"be{i}"] = 0.1 * jax.random.normal(keys[ki], (c,), jnp.float32); ki += 1
        params[f"m{i}"] = 0.1 * jax.random.normal(keys[ki], (c,), jnp.float32); ki += 1
        params[f"v{i}"] = 1.0 + 0.1 * jnp.abs(jax.random.normal(keys[ki], (c,), jnp.float32)); ki += 1
    return params


def _reference_forward(x, p):
    """Plain-JAX reference (un-folded BN) for correctness check."""

    def lin(h, w, b):
        return h @ w + b

    def bn(h, g, be, m, v):
        return (h - m) / jnp.sqrt(v + EPS) * g + be

    h = jax.nn.relu(lin(x, p["w1"], p["b1"])); h = bn(h, p["g1"], p["be1"], p["m1"], p["v1"])
    h = jax.nn.relu(lin(h, p["w2"], p["b2"])); h = bn(h, p["g2"], p["be2"], p["m2"], p["v2"])
    h = jax.nn.relu(lin(h, p["w3"], p["b3"])); h = bn(h, p["g3"], p["be3"], p["m3"], p["v3"])
    h = jax.nn.relu(lin(h, p["w4"], p["b4"])); h = bn(h, p["g4"], p["be4"], p["m4"], p["v4"])
    return lin(h, p["w5"], p["b5"])


if __name__ == "__main__":
    key = jax.random.PRNGKey(0)
    k_x, k_p = jax.random.split(key)

    batch, in_dim = 8, 16  # small demo shapes (in_dim = number of tabular features)
    x = jax.random.normal(k_x, (batch, in_dim), jnp.float32)
    params = _init_params(k_p, in_dim)

    y = swish_regressor_forward(x, params)
    y = jax.block_until_ready(y)

    y_ref = _reference_forward(x, params)
    assert y.shape == (batch, 1)
    # BN folding reassociates the affine math -> allow f32-level noise.
    assert jnp.allclose(y, y_ref, atol=1e-4, rtol=1e-4), "Pallas kernel mismatch vs reference"

    print("KERNEL_OK")
</pallas_src>

<mosaic_0001>
module attributes {stable_mosaic.version = 11 : i64} {
  func.func @_mlp_kernel(%arg0: i32, %arg1: memref<8x16xf32, #tpu.memory_space<vmem>>, %arg2: memref<16x32xf32, #tpu.memory_space<vmem>>, %arg3: memref<32x32xf32, #tpu.memory_space<vmem>>, %arg4: memref<32x64xf32, #tpu.memory_space<vmem>>, %arg5: memref<64x32xf32, #tpu.memory_space<vmem>>, %arg6: memref<1x32xf32, #tpu.memory_space<vmem>>, %arg7: memref<1x640xf32, #tpu.memory_space<vmem>>, %arg8: memref<8x1xf32, #tpu.memory_space<vmem>>) attributes {dimension_semantics = [#tpu.dimension_semantics<parallel>], iteration_bounds = array<i64: 1>, scalar_prefetch = 0 : i64, scratch_operands = 0 : i64, tpu.core_type = #tpu.core_type<tc>, window_params = [{transform_indices = @transform_0, window_bounds = array<i64: 8, 16>}, {pipeline_mode = #tpu.pipeline_mode<synchronous>, transform_indices = @transform_1, window_bounds = array<i64: 16, 32>}, {pipeline_mode = #tpu.pipeline_mode<synchronous>, transform_indices = @transform_2, window_bounds = array<i64: 32, 32>}, {pipeline_mode = #tpu.pipeline_mode<synchronous>, transform_indices = @transform_3, window_bounds = array<i64: 32, 64>}, {pipeline_mode = #tpu.pipeline_mode<synchronous>, transform_indices = @transform_4, window_bounds = array<i64: 64, 32>}, {pipeline_mode = #tpu.pipeline_mode<synchronous>, transform_indices = @transform_5, window_bounds = array<i64: 1, 32>}, {pipeline_mode = #tpu.pipeline_mode<synchronous>, transform_indices = @transform_6, window_bounds = array<i64: 1, 640>}, {transform_indices = @transform_7, window_bounds = array<i64: 8, 1>}]} {
    %c0 = arith.constant 0 : index
    %c0_0 = arith.constant 0 : index
    %0 = vector.load %arg1[%c0, %c0_0] : memref<8x16xf32, #tpu.memory_space<vmem>>, vector<8x16xf32>
    %c0_1 = arith.constant 0 : index
    %c0_2 = arith.constant 0 : index
    %1 = vector.load %arg7[%c0_1, %c0_2] : memref<1x640xf32, #tpu.memory_space<vmem>>, vector<1x32xf32>
    %c0_3 = arith.constant 0 : index
    %c0_4 = arith.constant 0 : index
    %2 = vector.load %arg2[%c0_3, %c0_4] : memref<16x32xf32, #tpu.memory_space<vmem>>, vector<16x32xf32>
    %cst = arith.constant dense<0.000000e+00> : vector<8x32xf32>
    %3 = tpu.matmul %0, %2, %cst {dimension_numbers = #tpu.dot_dimension_numbers<[1], [0], [0], [1], [0, 0, 1, 1], [], []>} : vector<8x16xf32>, vector<16x32xf32>, vector<8x32xf32> -> vector<8x32xf32>
    %4 = vector.broadcast %1 : vector<1x32xf32> to vector<8x32xf32>
    %5 = arith.addf %3, %4 : vector<8x32xf32>
    %cst_5 = arith.constant 0.000000e+00 : f32
    %6 = vector.broadcast %cst_5 : f32 to vector<8x32xf32>
    %7 = arith.maximumf %5, %6 : vector<8x32xf32>
    %c0_6 = arith.constant 0 : index
    %c128 = arith.constant 128 : index
    %8 = vector.load %arg7[%c0_6, %c128] : memref<1x640xf32, #tpu.memory_space<vmem>>, vector<1x32xf32>
    %c0_7 = arith.constant 0 : index
    %c0_8 = arith.constant 0 : index
    %9 = vector.load %arg3[%c0_7, %c0_8] : memref<32x32xf32, #tpu.memory_space<vmem>>, vector<32x32xf32>
    %cst_9 = arith.constant dense<0.000000e+00> : vector<8x32xf32>
    %10 = tpu.matmul %7, %9, %cst_9 {dimension_numbers = #tpu.dot_dimension_numbers<[1], [0], [0], [1], [0, 0, 1, 1], [], []>} : vector<8x32xf32>, vector<32x32xf32>, vector<8x32xf32> -> vector<8x32xf32>
    %11 = vector.broadcast %8 : vector<1x32xf32> to vector<8x32xf32>
    %12 = arith.addf %10, %11 : vector<8x32xf32>
    %cst_10 = arith.constant 0.000000e+00 : f32
    %13 = vector.broadcast %cst_10 : f32 to vector<8x32xf32>
    %14 = arith.maximumf %12, %13 : vector<8x32xf32>
    %c0_11 = arith.constant 0 : index
    %c256 = arith.constant 256 : index
    %15 = vector.load %arg7[%c0_11, %c256] : memref<1x640xf32, #tpu.memory_space<vmem>>, vector<1x64xf32>
    %c0_12 = arith.constant 0 : index
    %c0_13 = arith.constant 0 : index
    %16 = vector.load %arg4[%c0_12, %c0_13] : memref<32x64xf32, #tpu.memory_space<vmem>>, vector<32x64xf32>
    %cst_14 = arith.constant dense<0.000000e+00> : vector<8x64xf32>
    %17 = tpu.matmul %14, %16, %cst_14 {dimension_numbers = #tpu.dot_dimension_numbers<[1], [0], [0], [1], [0, 0, 1, 1], [], []>} : vector<8x32xf32>, vector<32x64xf32>, vector<8x64xf32> -> vector<8x64xf32>
    %18 = vector.broadcast %15 : vector<1x64xf32> to vector<8x64xf32>
    %19 = arith.addf %17, %18 : vector<8x64xf32>
    %cst_15 = arith.constant 0.000000e+00 : f32
    %20 = vector.broadcast %cst_15 : f32 to vector<8x64xf32>
    %21 = arith.maximumf %19, %20 : vector<8x64xf32>
    %c0_16 = arith.constant 0 : index
    %c384 = arith.constant 384 : index
    %22 = vector.load %arg7[%c0_16, %c384] : memref<1x640xf32, #tpu.memory_space<vmem>>, vector<1x32xf32>
    %c0_17 = arith.constant 0 : index
    %c0_18 = arith.constant 0 : index
    %23 = vector.load %arg5[%c0_17, %c0_18] : memref<64x32xf32, #tpu.memory_space<vmem>>, vector<64x32xf32>
    %cst_19 = arith.constant dense<0.000000e+00> : vector<8x32xf32>
    %24 = tpu.matmul %21, %23, %cst_19 {dimension_numbers = #tpu.dot_dimension_numbers<[1], [0], [0], [1], [0, 0, 1, 1], [], []>} : vector<8x64xf32>, vector<64x32xf32>, vector<8x32xf32> -> vector<8x32xf32>
    %25 = vector.broadcast %22 : vector<1x32xf32> to vector<8x32xf32>
    %26 = arith.addf %24, %25 : vector<8x32xf32>
    %cst_20 = arith.constant 0.000000e+00 : f32
    %27 = vector.broadcast %cst_20 : f32 to vector<8x32xf32>
    %28 = arith.maximumf %26, %27 : vector<8x32xf32>
    %c0_21 = arith.constant 0 : index
    %c512 = arith.constant 512 : index
    %29 = vector.load %arg7[%c0_21, %c512] : memref<1x640xf32, #tpu.memory_space<vmem>>, vector<1x1xf32>
    %c0_22 = arith.constant 0 : index
    %c0_23 = arith.constant 0 : index
    %30 = vector.load %arg6[%c0_22, %c0_23] : memref<1x32xf32, #tpu.memory_space<vmem>>, vector<1x32xf32>
    %31 = vector.broadcast %30 : vector<1x32xf32> to vector<8x32xf32>
    %32 = arith.mulf %28, %31 : vector<8x32xf32>
    %cst_24 = arith.constant dense<0.000000e+00> : vector<8xf32>
    %33 = vector.multi_reduction <add>, %32, %cst_24 [1] : vector<8x32xf32> to vector<8xf32>
    %34 = vector.shape_cast %33 : vector<8xf32> to vector<8x1xf32>
    %35 = vector.broadcast %29 : vector<1x1xf32> to vector<8x1xf32>
    %36 = arith.addf %34, %35 : vector<8x1xf32>
    %c0_25 = arith.constant 0 : index
    %c0_26 = arith.constant 0 : index
    %37 = vector.load %arg8[%c0_25, %c0_26] : memref<8x1xf32, #tpu.memory_space<vmem>>, vector<8x1xf32>
    tpu.vector_store %arg8[%c0_25, %c0_26], %36 {strides = array<i32>} : memref<8x1xf32, #tpu.memory_space<vmem>>, vector<8x1xf32>,
    return
  }
  func.func @transform_0(%arg0: i32) -> (i32, i32) {
    %c0_i32 = arith.constant 0 : i32
    %c0_i32_0 = arith.constant 0 : i32
    return %arg0, %c0_i32 : i32, i32
  }
  func.func @transform_1(%arg0: i32) -> (i32, i32) {
    %c0_i32 = arith.constant 0 : i32
    %c0_i32_0 = arith.constant 0 : i32
    %c0_i32_1 = arith.constant 0 : i32
    return %c0_i32, %c0_i32_0 : i32, i32
  }
  func.func @transform_2(%arg0: i32) -> (i32, i32) {
    %c0_i32 = arith.constant 0 : i32
    %c0_i32_0 = arith.constant 0 : i32
    %c0_i32_1 = arith.constant 0 : i32
    return %c0_i32, %c0_i32_0 : i32, i32
  }
  func.func @transform_3(%arg0: i32) -> (i32, i32) {
    %c0_i32 = arith.constant 0 : i32
    %c0_i32_0 = arith.constant 0 : i32
    %c0_i32_1 = arith.constant 0 : i32
    return %c0_i32, %c0_i32_0 : i32, i32
  }
  func.func @transform_4(%arg0: i32) -> (i32, i32) {
    %c0_i32 = arith.constant 0 : i32
    %c0_i32_0 = arith.constant 0 : i32
    %c0_i32_1 = arith.constant 0 : i32
    return %c0_i32, %c0_i32_0 : i32, i32
  }
  func.func @transform_5(%arg0: i32) -> (i32, i32) {
    %c0_i32 = arith.constant 0 : i32
    %c0_i32_0 = arith.constant 0 : i32
    %c0_i32_1 = arith.constant 0 : i32
    return %c0_i32, %c0_i32_0 : i32, i32
  }
  func.func @transform_6(%arg0: i32) -> (i32, i32) {
    %c0_i32 = arith.constant 0 : i32
    %c0_i32_0 = arith.constant 0 : i32
    %c0_i32_1 = arith.constant 0 : i32
    return %c0_i32, %c0_i32_0 : i32, i32
  }
  func.func @transform_7(%arg0: i32) -> (i32, i32) {
    %c0_i32 = arith.constant 0 : i32
    %c0_i32_0 = arith.constant 0 : i32
    return %arg0, %c0_i32 : i32, i32
  }
}

</mosaic_0001>

<bundles_post_ra>
// kernel: swish_regressor_forward.1
= control target key start
LH: loop header
LB: loop body
LE: loop exit
PB: predicated region body
PF: predicated region fallthrough
CT: control target
= control target key end

     0   :  { %v507_v0 = vmov 0.0|0.0   ;;  %vm508_vm0 = vmmov 0   ;;  %v509_v3 = vmov 0.0   ;;  %vm36_vm1 = vcmask 130048   ;;  %s635_s1 = inlined_call_operand.vmem [shape: f32[16,32], index: 1, kind: input, shape index: {}]   ;;  %s636_s2 = inlined_call_operand.vmem [shape: f32[32,32], index: 2, kind: input, shape index: {}]   ;;  %s637_s0 = inlined_call_operand.vmem [shape: f32[8,16], index: 0, kind: input, shape index: {}]   ;;  %s638_s6 = inlined_call_operand.vmem [shape: f32[1,640], index: 6, kind: input, shape index: {}]   ;;  %s639_s3 = inlined_call_operand.vmem [shape: f32[32,64], index: 3, kind: input, shape index: {}]   ;;  %s640_s4 = inlined_call_operand.vmem [shape: f32[64,32], index: 4, kind: input, shape index: {}]   ;;  %s641_s5 = inlined_call_operand.vmem [shape: f32[1,32], index: 5, kind: input, shape index: {}]   ;;  %s642_s7 = inlined_call_operand.vmem [shape: f32[8,1], index: 7, kind: output, shape index: {}]  }
   0x1   :  { %477 = vmatprep.subr.bf16.mxu0 %v507_v0  ;;  %v28_v1 = vld [vmem:[%s635_s1] sm:$0xff]  ;;  %v29_v2 = vld [vmem:[%s635_s1 + $0x8] sm:$0xff]  ;;  %433 = vmatprep.mubr.msk.f32.mxu0 %vm508_vm0, %v509_v3  ;;  %v114_v9 = vld [vmem:[%s636_s2 + $0x10] sm:$0xff]  ;;  %vm122_vm2 = vcmask 261120   ;;  %vm297_vm3 = vcmask 523264   ;;  %vm391_vm4 = vcmask 7168  }
   0x2   :  { %v478_v4 = vpack.c.bf16 %v29_v2, %v28_v1  ;;  %v112_v5 = vld [vmem:[%s636_s2] sm:$0xff]  ;;  %v113_v6 = vld [vmem:[%s636_s2 + $0x8] sm:$0xff]  ;;  %492 = vmatprep.subr.bf16.mxu1 %v507_v0  ;;  %474 = vmatprep.mubr.msk.f32.mxu1 %vm508_vm0, %v509_v3  ;;  %v115_v10 = vld [vmem:[%s636_s2 + $0x18] sm:$0xff] }
   0x3   :  { %v26_v7 = vld [vmem:[%s637_s0] sm:$0xff]  ;;  %v481_v8 = vpack.c.bf16 %v113_v6, %v112_v5  ;;  %v484_v11 = vpack.c.bf16 %v115_v10, %v114_v9  ;;  %v199_v14 = vld [vmem:[%s639_s3 + $0x8] sm:$0xff]  ;;  %v200_v20 = vld [vmem:[%s639_s3 + $0x10] sm:$0xff] }
   0x4   :  { %479 = vmatpush3.bf16.msra.mxu0 %v478_v4  ;;  %v397_v12 = vld [vmem:[%s638_s6] ss:$0 sm:$0xff]  ;;  %v201_v21 = vld [vmem:[%s639_s3 + $0x18] sm:$0xff]  ;;  %v284_v24 = vld [vmem:[%s640_s4 + $0x8] sm:$0xff] }
   0x5   :  { %480 = vmatprep.subr.bf16.mxu0 %v507_v0  ;;  %v198_v13 = vld [vmem:[%s639_s3] sm:$0xff]  ;;  %v490_v22 = vpack.c.bf16 %v201_v21, %v200_v20  ;;  %v285_v25 = vld [vmem:[%s640_s4 + $0x10] sm:$0xff]  ;;  %v286_v27 = vld [vmem:[%s640_s4 + $0x18] sm:$0xff] }
   0x6   :  { %v487_v18 = vpack.c.bf16 %v199_v14, %v198_v13  ;;  %v283_v23 = vld [vmem:[%s640_s4] sm:$0xff]  ;;  %v496_v28 = vpack.c.bf16 %v286_v27, %v285_v25  ;;  %v288_v30 = vld [vmem:[%s640_s4 + $0x28] sm:$0xff]  ;;  %v289_v37 = vld [vmem:[%s640_s4 + $0x30] sm:$0xff] }
   0x7   :  { %434 = vmatmul.mubr.msk.f32.vlgmr.msra.gmra.mrb[0].mxu0 %vm36_vm1, %v26_v7  ;;  %v493_v26 = vpack.c.bf16 %v284_v24, %v283_v23  ;;  %v287_v29 = vld [vmem:[%s640_s4 + $0x20] sm:$0xff]  ;;  %v290_v38 = vld [vmem:[%s640_s4 + $0x38] sm:$0xff] }
   0x8   :  { %482 = vmatpush3.bf16.msra.mxu0 %v481_v8  ;;  %444 = vmatprep.mubr.msk.f32.mxu0 %vm508_vm0, %v509_v3  ;;  %v499_v31 = vpack.c.bf16 %v288_v30, %v287_v29  ;;  %v399_v32 = vld [vmem:[%s638_s6 + $0x1] ss:$0 sm:$0xff]  ;;  %v502_v39 = vpack.c.bf16 %v290_v38, %v289_v37  ;;  %v401_v40 = vld [vmem:[%s638_s6 + $0x2] ss:$0 sm:$0xff]  ;;  %v403_v45 = vld [vmem:[%s638_s6 + $0x3] ss:$0 sm:$0xff] }
   0x9   :  { %483 = vmatprep.subr.bf16.mxu0 %v507_v0  ;;  %494 = vmatpush3.bf16.msra.mxu1 %v493_v26  ;;  %v405_v49 = vld [vmem:[%s641_s5] ss:$0 sm:$0xff]  ;;  %v406_v53 = vld [vmem:[%s638_s6 + $0x4] ss:$0 sm:$0xff] }
   0xa   :  { %495 = vmatprep.subr.bf16.mxu1 %v507_v0 }
   0xc   :  { %485 = vmatpush3.bf16.msra.mxu0 %v484_v11 }
   0xd   :  { %486 = vmatprep.subr.bf16.mxu0 %v507_v0  ;;  %497 = vmatpush3.bf16.msra.mxu1 %v496_v28 }
   0xe   :  { %498 = vmatprep.subr.bf16.mxu1 %v507_v0 }
  0x11   :  { %500 = vmatpush3.bf16.msra.mxu1 %v499_v31 }
  0x12   :  { %501 = vmatprep.subr.bf16.mxu1 %v507_v0 }
  0x15   :  { %503 = vmatpush3.bf16.msra.mxu1 %v502_v39 }
  0xda   :  { %v106_v15 = vpop.f32.mrb[0].mxu0 }
  0xdb   :  { %v107_v16 = vadd.f32 %v397_v12, %v106_v15  ;;  %v435_v17 = vpop.f32.mrb[1].mxu0 }
  0xdd   :  { %v110_v19 = vmax.f32 %v107_v16, 0.0 }
  0xdf   :  { %445 = vmatmul.mubr.msk.f32.vlgmr.msra.gmra.mrb[2].mxu0 %vm122_vm2, %v110_v19 }
  0xe0   :  { %488 = vmatpush3.bf16.msra.mxu0 %v487_v18  ;;  %455 = vmatprep.mubr.msk.f32.mxu0 %vm508_vm0, %v509_v3 }
  0xe1   :  { %489 = vmatprep.subr.bf16.mxu0 %v507_v0 }
  0xe4   :  { %491 = vmatpush3.bf16.msra.mxu0 %v490_v22 }
 0x1b2   :  { %v192_v33 = vpop.f32.mrb[2].mxu0 }
 0x1b3   :  { %v193_v34 = vadd.f32 %v399_v32, %v192_v33  ;;  %v446_v35 = vpop.f32.mrb[3].mxu0 }
 0x1b5   :  { %v196_v36 = vmax.f32 %v193_v34, 0.0 }
 0x1b7   :  { %456 = vmatmul.mubr.msk.f32.vlgmr.msra.gmra.mrb[4].mxu0 %vm122_vm2, %v196_v36 }
 0x28a   :  { %v277_v41 = vpop.f32.mrb[4].mxu0 }
 0x28b   :  { %v278_v42 = vadd.f32 %v401_v40, %v277_v41  ;;  %v457_v43 = vpop.f32.mrb[5].mxu0 }
 0x28d   :  { %v281_v44 = vmax.f32 %v278_v42, 0.0 }
 0x28f   :  { %475 = vmatmul.mubr.msk.f32.vlgmr.msra.gmra.mrb[0].mxu1 %vm297_vm3, %v281_v44 }
 0x362   :  { %v367_v46 = vpop.f32.mrb[0].mxu1 }
 0x363   :  { %v368_v47 = vadd.f32 %v403_v45, %v367_v46  ;;  %v476_v48 = vpop.f32.mrb[1].mxu1 }
 0x365   :  { %v371_v50 = vmax.f32 %v368_v47, 0.0 }
 0x367   :  { %v380_v51 = vmul.f32 %v405_v49, %v371_v50 }
 0x369   :  { %v381_v52 = vsel %vm122_vm2, %v380_v51, 0.0 }
 0x36a   :  { %382 = vadd.xlane.f32.xlu0 %v381_v52 }
 0x3f7   :  { %v383_v54 = vpop.xlane.xlu0 %382 }
 0x3f8   :  { %v390_v55 = vadd.f32 %v406_v53, %v383_v54 }
 0x3fa   :  { %392 = vst.msk [vmem:[%s642_s7] sm:$0xff] %vm391_vm4, %v390_v55 }

</bundles_post_ra>
